<compile_context>
chip_gen: v7x
topology: tpu7x:2x2x1
jax: 0.10.0
libtpu: 0.0.40
codegen_flags: <defaults>
</compile_context>

<pallas_src>
import functools

import jax
import jax.numpy as jnp
from jax.experimental import pallas as pl
from jax.experimental.pallas import tpu as pltpu


def _round_up(n, k):
    return ((n + k - 1) // k) * k


def _pick_tile(total, cap):
    """Largest multiple of 8 that divides `total` (a multiple of 8), capped at `cap`."""
    cap = max(8, cap - cap % 8)
    t = min(cap, total)
    t -= t % 8
    t = max(t, 8)
    while total % t != 0:
        t -= 8
    return t


def _vmem_limit_bytes():
    """Scoped-VMEM budget: generous on 128 MiB parts, conservative on v7x (64 MiB)."""
    cap = 64 * 1024 * 1024
    try:
        info = pltpu.get_tpu_info()
        cap = int(getattr(info, "vmem_capacity_bytes", cap))
    except Exception:
        pass
    return int(min(cap - 16 * 1024 * 1024, 100 * 1024 * 1024))


def _gate_pad_cols(w, H, Hp):
    """w: (rows, 3H) with columns [r|z|n] -> (rows, 3*Hp), each gate 128-lane aligned."""
    rows = w.shape[0]
    out = jnp.zeros((rows, 3 * Hp), jnp.float32)
    for g in range(3):
        out = out.at[:, g * Hp:g * Hp + H].set(w[:, g * H:(g + 1) * H])
    return out


# ---------------------------------------------------------------------------
# Kernel 1: in-kernel unfold conv1 + ReLU + fused GRU input projection
#           (time-major, gate-padded outputs)
# ---------------------------------------------------------------------------
def _conv_proj_kernel(x_ref, wc_ref, bc_ref, wp_ref, bp_ref, *out_refs, Ck, Ttot, G1):
    Bt = x_ref.shape[1]
    m = x_ref.shape[2]
    hidCp = wc_ref.shape[2]

    # conv1 as Ck shifted (Ttot*Bt, m) @ (m, hidC) accumulations; x block is
    # time-major so the shifted windows are free leading-dim slices in VMEM.
    acc = jnp.zeros((Ttot * Bt, hidCp), jnp.float32)
    for k in range(Ck):
        xk = x_ref[k:k + Ttot].reshape(Ttot * Bt, m)
        acc = acc + jnp.dot(xk, wc_ref[k], preferred_element_type=jnp.float32)
    c = jnp.maximum(acc + bc_ref[...], 0.0)                       # bias + ReLU

    # single fused projection for both GRUs (lane-aligned column split below)
    gi = jnp.dot(c, wp_ref[...], preferred_element_type=jnp.float32) + bp_ref[...]

    gi1_ref = out_refs[0]
    gi1_ref[...] = gi[:, :G1].reshape(Ttot, Bt, G1)
    if len(out_refs) > 1:
        gis_ref = out_refs[1]
        GS = gis_ref.shape[2]
        gis_ref[...] = gi[:, G1:G1 + GS].reshape(Ttot, Bt, GS)


def conv_proj_call(x_tm, wc, bc, wp, bp, *, Ttot, G1, GS, bt, vmem_limit):
    Ppad, Bp, m = x_tm.shape
    Ck, _, hidCp = wc.shape
    Gtot = wp.shape[1]
    in_specs = [
        pl.BlockSpec((Ppad, bt, m), lambda i: (0, i, 0)),
        pl.BlockSpec((Ck, m, hidCp), lambda i: (0, 0, 0)),
        pl.BlockSpec((1, hidCp), lambda i: (0, 0)),
        pl.BlockSpec((hidCp, Gtot), lambda i: (0, 0)),
        pl.BlockSpec((1, Gtot), lambda i: (0, 0)),
    ]
    params = pltpu.CompilerParams(dimension_semantics=("parallel",),
                                  vmem_limit_bytes=vmem_limit)
    kern = functools.partial(_conv_proj_kernel, Ck=Ck, Ttot=Ttot, G1=G1)
    if GS > 0:
        gi1, gis = pl.pallas_call(
            kern,
            out_shape=(jax.ShapeDtypeStruct((Ttot, Bp, G1), jnp.float32),
                       jax.ShapeDtypeStruct((Ttot, Bp, GS), jnp.float32)),
            grid=(Bp // bt,),
            in_specs=in_specs,
            out_specs=(pl.BlockSpec((Ttot, bt, G1), lambda i: (0, i, 0)),
                       pl.BlockSpec((Ttot, bt, GS), lambda i: (0, i, 0))),
            compiler_params=params,
        )(x_tm, wc, bc, wp, bp)
        return gi1, gis
    gi1 = pl.pallas_call(
        kern,
        out_shape=jax.ShapeDtypeStruct((Ttot, Bp, G1), jnp.float32),
        grid=(Bp // bt,),
        in_specs=in_specs,
        out_specs=pl.BlockSpec((Ttot, bt, G1), lambda i: (0, i, 0)),
        compiler_params=params,
    )(x_tm, wc, bc, wp, bp)
    return gi1, None


# ---------------------------------------------------------------------------
# Kernel 2: GRU recurrence, time-chunked, h kept in a VMEM scratch accumulator
# ---------------------------------------------------------------------------
def _gru_kernel(gi_ref, whh_ref, bhhn_ref, h_ref, h_acc, *, Hp, Tc, T_real, Ttot):
    t_blk = pl.program_id(1)

    @pl.when(t_blk == 0)
    def _():
        h_acc[...] = jnp.zeros_like(h_acc)

    whh = whh_ref[...]                                   # (Hp, 3Hp), gate-padded
    Bt = h_acc.shape[0]
    # broadcast the n-gate recurrent bias once (not per time step)
    bhhn = jnp.broadcast_to(bhhn_ref[...], (Bt, Hp))

    def step(s, h):
        gi_t = gi_ref[s]                                 # (Bt, 3Hp), gate-aligned
        gh = jnp.dot(h, whh, preferred_element_type=jnp.float32)
        r = jax.nn.sigmoid(gi_t[:, 0:Hp] + gh[:, 0:Hp])
        z = jax.nn.sigmoid(gi_t[:, Hp:2 * Hp] + gh[:, Hp:2 * Hp])
        n = jnp.tanh(gi_t[:, 2 * Hp:3 * Hp] + r * (gh[:, 2 * Hp:3 * Hp] + bhhn))
        h_new = (1.0 - z) * n + z * h
        if Ttot != T_real:                               # mask padded time steps
            h_new = jnp.where(t_blk * Tc + s < T_real, h_new, h)
        return h_new

    h = h_acc[...]
    if Tc >= 2:
        def step2(i, hh):                                # 2x unroll for scheduler visibility
            return step(2 * i + 1, step(2 * i, hh))
        h = jax.lax.fori_loop(0, Tc // 2, step2, h)
    if Tc % 2:
        h = step(Tc - 1, h)
    h_acc[...] = h

    @pl.when(t_blk == pl.num_programs(1) - 1)
    def _():
        h_ref[...] = h


def gru_last_hidden(gi_seq, w_hh, b_hh, H, *, Tc, T_real, bt, vmem_limit):
    """gi_seq: (Ttot, Bp, 3*Hp) time-major, gate-padded, with b_ih + b_hh_{r,z}
    already folded in.  Returns the last hidden state (Bp, Hp)."""
    Ttot, Bp, G = gi_seq.shape
    Hp = G // 3
    whh = _gate_pad_cols(jnp.asarray(w_hh, jnp.float32).T, H, Hp)       # (H, 3Hp)
    whh = jnp.pad(whh, ((0, Hp - H), (0, 0)))                           # (Hp, 3Hp)
    bhhn = jnp.pad(jnp.asarray(b_hh, jnp.float32)[2 * H:3 * H],
                   (0, Hp - H)).reshape(1, Hp)
    nt = Ttot // Tc
    return pl.pallas_call(
        functools.partial(_gru_kernel, Hp=Hp, Tc=Tc, T_real=T_real, Ttot=Ttot),
        out_shape=jax.ShapeDtypeStruct((Bp, Hp), jnp.float32),
        grid=(Bp // bt, nt),
        in_specs=[
            pl.BlockSpec((Tc, bt, G), lambda i, t: (t, i, 0)),
            pl.BlockSpec((Hp, 3 * Hp), lambda i, t: (0, 0)),
            pl.BlockSpec((1, Hp), lambda i, t: (0, 0)),
        ],
        out_specs=pl.BlockSpec((bt, Hp), lambda i, t: (i, 0)),
        scratch_shapes=[pltpu.VMEM((bt, Hp), jnp.float32)],
        compiler_params=pltpu.CompilerParams(
            dimension_semantics=("parallel", "arbitrary"),
            vmem_limit_bytes=vmem_limit),
    )(gi_seq, whh, bhhn)


# ---------------------------------------------------------------------------
# Kernel 3: head = linear1 + highway + output activation + final linear
# ---------------------------------------------------------------------------
def _head_kernel(rcat_ref, w1_ref, b1_ref, zx_ref, whw_ref, wlin_ref, blin_ref,
                 o_ref, *, use_sigmoid, use_tanh, use_highway):
    res = jnp.dot(rcat_ref[...], w1_ref[...],
                  preferred_element_type=jnp.float32) + b1_ref[...]
    if use_highway:
        # highway: single contraction over the hw axis (bias folded into b1)
        res = res + jnp.sum(zx_ref[...] * whw_ref[...], axis=1)
    if use_sigmoid:
        res = jax.nn.sigmoid(res)
    elif use_tanh:
        res = jnp.tanh(res)
    o_ref[...] = jnp.dot(res, wlin_ref[...],
                         preferred_element_type=jnp.float32) + blin_ref[...]


def head_call(rcat, w1, b1, zx, whw, wlin, blin, *, bt, output_func, use_highway,
              vmem_limit):
    Bp, F = rcat.shape
    m = w1.shape[1]
    hw = zx.shape[1]
    return pl.pallas_call(
        functools.partial(_head_kernel,
                          use_sigmoid=(output_func == 'sigmoid'),
                          use_tanh=(output_func == 'tanh'),
                          use_highway=use_highway),
        out_shape=jax.ShapeDtypeStruct((Bp, 1), jnp.float32),
        grid=(Bp // bt,),
        in_specs=[
            pl.BlockSpec((bt, F), lambda i: (i, 0)),
            pl.BlockSpec((F, m), lambda i: (0, 0)),
            pl.BlockSpec((1, m), lambda i: (0, 0)),
            pl.BlockSpec((bt, hw, m), lambda i: (i, 0, 0)),
            pl.BlockSpec((1, hw, 1), lambda i: (0, 0, 0)),
            pl.BlockSpec((m, 1), lambda i: (0, 0)),
            pl.BlockSpec((1, 1), lambda i: (0, 0)),
        ],
        out_specs=pl.BlockSpec((bt, 1), lambda i: (i, 0)),
        compiler_params=pltpu.CompilerParams(
            dimension_semantics=("parallel",),
            vmem_limit_bytes=vmem_limit),
    )(rcat, w1, b1, zx, whw, wlin, blin)


# ---------------------------------------------------------------------------
# Full forward (glue in plain JAX, hot paths in Pallas)
# ---------------------------------------------------------------------------
def lstnet_forward(x, p, *, Ck, hidC, hidR, hidS, hw, output_func='sigmoid'):
    x = jnp.asarray(x, jnp.float32)
    B, P, m = x.shape
    skip = P - Ck                               # as hard-coded in the PyTorch module
    pt = (P - Ck) // skip if skip > 0 else 0
    T = P - Ck + 1

    vmem_limit = _vmem_limit_bytes()

    hidC_p = _round_up(hidC, 128)
    Hp1 = _round_up(hidR, 128)
    G1 = 3 * Hp1
    if skip > 0:
        Hps = _round_up(hidS, 128)
        GS = 3 * Hps
    else:
        Hps, GS = 0, 0
    Gtot = G1 + GS

    # GRU time chunking (chunk <= 32, minimal padding)
    n_tchunks = max(1, (T + 31) // 32)
    Tc = (T + n_tchunks - 1) // n_tchunks
    Ttot = n_tchunks * Tc
    P_pad = max(P, Ttot + Ck - 1)

    Bp = _round_up(B, 8)

    # --- kernel-1 batch tile from a VMEM budget ---
    def k1_bytes(bt):
        return 4 * (2 * P_pad * bt * m
                    + 2 * Ttot * bt * (G1 + GS)
                    + Ttot * bt * (2 * hidC_p + Gtot)
                    + 2 * (Ck * m * hidC_p + hidC_p * Gtot))
    bt1 = _pick_tile(Bp, 256)
    while bt1 > 8 and k1_bytes(bt1) > int(vmem_limit * 0.6):
        bt1 = _pick_tile(Bp, bt1 - 8)

    # --- x: time-major (P_pad, Bp, m); the only data-movement glue left ---
    x_tm = jnp.transpose(x, (1, 0, 2))
    x_tm = jnp.pad(x_tm, ((0, P_pad - P), (0, Bp - B), (0, 0)))

    # --- weights for kernel 1 ---
    wc = jnp.transpose(jnp.asarray(p['conv_w'], jnp.float32)[:, 0, :, :], (1, 2, 0))
    wc = jnp.pad(wc, ((0, 0), (0, 0), (0, hidC_p - hidC)))           # (Ck, m, hidC_p)
    bc = jnp.pad(jnp.asarray(p['conv_b'], jnp.float32),
                 (0, hidC_p - hidC)).reshape(1, hidC_p)

    w1 = _gate_pad_cols(jnp.asarray(p['gru1_w_ih'], jnp.float32).T, hidR, Hp1)
    b1v = jnp.asarray(p['gru1_b_ih'], jnp.float32) + jnp.concatenate(
        [jnp.asarray(p['gru1_b_hh'], jnp.float32)[:2 * hidR],
         jnp.zeros((hidR,), jnp.float32)])                           # fold b_hh_{r,z}
    b1 = _gate_pad_cols(b1v.reshape(1, 3 * hidR), hidR, Hp1)
    if skip > 0:
        ws = _gate_pad_cols(jnp.asarray(p['grus_w_ih'], jnp.float32).T, hidS, Hps)
        bsv = jnp.asarray(p['grus_b_ih'], jnp.float32) + jnp.concatenate(
            [jnp.asarray(p['grus_b_hh'], jnp.float32)[:2 * hidS],
             jnp.zeros((hidS,), jnp.float32)])
        bs = _gate_pad_cols(bsv.reshape(1, 3 * hidS), hidS, Hps)
        wp = jnp.concatenate([w1, ws], axis=1)
        bp = jnp.concatenate([b1, bs], axis=1)
    else:
        wp, bp = w1, b1
    wp = jnp.pad(wp, ((0, hidC_p - hidC), (0, 0)))                   # (hidC_p, Gtot)

    gi1, gis = conv_proj_call(x_tm, wc, bc, wp, bp, Ttot=Ttot, G1=G1, GS=GS,
                              bt=bt1, vmem_limit=vmem_limit)

    # --- GRU1 (time-chunked recurrence) ---
    def gru_bytes(bt, G, Hp, tc):
        return 4 * (2 * tc * bt * G + 2 * Hp * 3 * Hp + bt * Hp + 6 * bt * 3 * Hp)

    cap_b = Bp // 2 if Bp >= 16 else Bp          # >=2 blocks so both TCs get work
    btg = _pick_tile(Bp, min(256, cap_b))
    while btg > 8 and gru_bytes(btg, G1, Hp1, Tc) > int(vmem_limit * 0.6):
        btg = _pick_tile(Bp, btg - 8)
    r1 = gru_last_hidden(gi1, p['gru1_w_hh'], p['gru1_b_hh'], hidR,
                         Tc=Tc, T_real=T, bt=btg, vmem_limit=vmem_limit)
    r1 = r1[:B, :hidR]

    # --- skip GRU (pt == 1 for this module); regroup is a pure reshape ---
    if skip > 0:
        s_seq = gis[T - pt * skip:T].reshape(pt, skip * Bp, GS)
        BSp = skip * Bp
        cap_bs = BSp // 2 if BSp >= 16 else BSp
        bts = _pick_tile(BSp, min(256, cap_bs))
        while bts > 8 and gru_bytes(bts, GS, Hps, pt) > int(vmem_limit * 0.6):
            bts = _pick_tile(BSp, bts - 8)
        hs = gru_last_hidden(s_seq, p['grus_w_hh'], p['grus_b_hh'], hidS,
                             Tc=pt, T_real=pt, bt=bts, vmem_limit=vmem_limit)
        s_flat = (hs.reshape(skip, Bp, Hps)[:, :B, :hidS]
                  .transpose(1, 0, 2).reshape(B, skip * hidS))       # small reorder
        rcat = jnp.concatenate([r1, s_flat], axis=1)
    else:
        rcat = r1

    # --- head ---
    Bph = _round_up(B, 8)
    rcat_p = jnp.pad(rcat, ((0, Bph - B), (0, 0)))
    lin1_b = jnp.asarray(p['linear1_b'], jnp.float32).reshape(1, m)
    if hw > 0:
        zx = jnp.pad(x[:, P - hw:, :], ((0, Bph - B), (0, 0), (0, 0)))
        whw = jnp.asarray(p['highway_w'], jnp.float32).reshape(1, hw, 1)
        b1h = lin1_b + jnp.asarray(p['highway_b'], jnp.float32).reshape(1, 1)
    else:
        zx = jnp.zeros((Bph, 1, m), jnp.float32)
        whw = jnp.zeros((1, 1, 1), jnp.float32)
        b1h = lin1_b
    bth = _pick_tile(Bph, 256)
    out = head_call(rcat_p, jnp.asarray(p['linear1_w'], jnp.float32).T, b1h,
                    zx, whw, jnp.asarray(p['linear_w'], jnp.float32).T,
                    jnp.asarray(p['linear_b'], jnp.float32).reshape(1, 1),
                    bt=bth, output_func=output_func, use_highway=(hw > 0),
                    vmem_limit=vmem_limit)
    return out[:B, 0]                                # (B,) == squeeze(dim=1)


# ---------------------------------------------------------------------------
# Deterministic parameter init (shapes as in the PyTorch module __init__)
# ---------------------------------------------------------------------------
def init_params(key, P, m, hidC, hidR, hidS, Ck, hw):
    skip = P - Ck
    keys = jax.random.split(key, 16)

    def rnd(k, shape, scale=0.2):
        return scale * jax.random.normal(k, shape, dtype=jnp.float32)

    return dict(
        conv_w=rnd(keys[0], (hidC, 1, Ck, m)),
        conv_b=rnd(keys[1], (hidC,)),
        gru1_w_ih=rnd(keys[2], (3 * hidR, hidC)),
        gru1_w_hh=rnd(keys[3], (3 * hidR, hidR)),
        gru1_b_ih=rnd(keys[4], (3 * hidR,)),
        gru1_b_hh=rnd(keys[5], (3 * hidR,)),
        grus_w_ih=rnd(keys[6], (3 * hidS, hidC)),
        grus_w_hh=rnd(keys[7], (3 * hidS, hidS)),
        grus_b_ih=rnd(keys[8], (3 * hidS,)),
        grus_b_hh=rnd(keys[9], (3 * hidS,)),
        linear1_w=rnd(keys[10], (m, hidR + skip * hidS)),
        linear1_b=rnd(keys[11], (m,)),
        highway_w=rnd(keys[12], (1, hw)),
        highway_b=rnd(keys[13], (1,)),
        linear_w=rnd(keys[14], (1, m)),
        linear_b=rnd(keys[15], (1,)),
    )


# ---------------------------------------------------------------------------
# Pure-JAX reference (mirrors the PyTorch forward) for a correctness check
# ---------------------------------------------------------------------------
def _gru_ref(x_seq, w_ih, w_hh, b_ih, b_hh, H):
    def cell(h, x_t):
        gi = x_t @ w_ih.T + b_ih
        gh = h @ w_hh.T + b_hh
        r = jax.nn.sigmoid(gi[:, :H] + gh[:, :H])
        z = jax.nn.sigmoid(gi[:, H:2 * H] + gh[:, H:2 * H])
        n = jnp.tanh(gi[:, 2 * H:] + r * gh[:, 2 * H:])
        return (1.0 - z) * n + z * h, None

    h0 = jnp.zeros((x_seq.shape[1], H), jnp.float32)
    h, _ = jax.lax.scan(cell, h0, x_seq)
    return h


def reference_forward(x, p, *, Ck, hidC, hidR, hidS, hw, output_func='sigmoid'):
    B, P, m = x.shape
    skip = P - Ck
    pt = (P - Ck) // skip
    T = P - Ck + 1
    xc = x.reshape(B, 1, P, m)
    c = jax.lax.conv_general_dilated(xc, p['conv_w'], (1, 1), 'VALID',
                                     dimension_numbers=('NCHW', 'OIHW', 'NCHW'))
    c = jnp.maximum(c + p['conv_b'].reshape(1, hidC, 1, 1), 0.0)[..., 0]  # (B, hidC, T)
    r = _gru_ref(jnp.transpose(c, (2, 0, 1)),
                 p['gru1_w_ih'], p['gru1_w_hh'], p['gru1_b_ih'], p['gru1_b_hh'], hidR)
    s = c[:, :, T - pt * skip:]
    s = s.reshape(B, hidC, pt, skip).transpose(2, 0, 3, 1).reshape(pt, B * skip, hidC)
    s = _gru_ref(s, p['grus_w_ih'], p['grus_w_hh'], p['grus_b_ih'], p['grus_b_hh'], hidS)
    r = jnp.concatenate([r, s.reshape(B, skip * hidS)], axis=1)
    res = r @ p['linear1_w'].T + p['linear1_b']
    z = x[:, P - hw:, :].transpose(0, 2, 1).reshape(B * m, hw)
    z = (z @ p['highway_w'].T + p['highway_b']).reshape(B, m)
    res = res + z
    if output_func == 'sigmoid':
        res = jax.nn.sigmoid(res)
    elif output_func == 'tanh':
        res = jnp.tanh(res)
    return (res @ p['linear_w'].T + p['linear_b'])[:, 0]


if __name__ == "__main__":
    # Small config: P=8, m=16, Ck=4  =>  skip=4, pt=1, T=5; hw=4; output_func='sigmoid'.
    B, P, m = 2, 8, 16
    Ck, hidC, hidR, hidS, hw = 4, 8, 16, 8, 4

    key = jax.random.PRNGKey(0)
    kx, kp = jax.random.split(key)
    x = jax.random.normal(kx, (B, P, m), dtype=jnp.float32)
    params = init_params(kp, P, m, hidC, hidR, hidS, Ck, hw)

    out = lstnet_forward(x, params, Ck=Ck, hidC=hidC, hidR=hidR, hidS=hidS,
                         hw=hw, output_func='sigmoid')
    out = jax.block_until_ready(out)

    ref = reference_forward(x, params, Ck=Ck, hidC=hidC, hidR=hidR, hidS=hidS,
                            hw=hw, output_func='sigmoid')
    assert out.shape == (B,)
    if not jnp.allclose(out, ref, atol=1e-3, rtol=1e-3):
        raise AssertionError(f"Pallas/JAX mismatch: {out} vs {ref}")
    print("KERNEL_OK")
</pallas_src>

<mosaic_0001>
module attributes {stable_mosaic.version = 11 : i64} {
  func.func @_conv_proj_kernel(%arg0: i32, %arg1: memref<8x8x16xf32, #tpu.memory_space<vmem>>, %arg2: memref<4x16x128xf32, #tpu.memory_space<vmem>>, %arg3: memref<1x128xf32, #tpu.memory_space<vmem>>, %arg4: memref<128x768xf32, #tpu.memory_space<vmem>>, %arg5: memref<1x768xf32, #tpu.memory_space<vmem>>, %arg6: memref<5x8x384xf32, #tpu.memory_space<vmem>>, %arg7: memref<5x8x384xf32, #tpu.memory_space<vmem>>) attributes {dimension_semantics = [#tpu.dimension_semantics<parallel>], iteration_bounds = array<i64: 1>, scalar_prefetch = 0 : i64, scratch_operands = 0 : i64, tpu.core_type = #tpu.core_type<tc>, window_params = [{transform_indices = @transform_0, window_bounds = array<i64: 8, 8, 16>}, {pipeline_mode = #tpu.pipeline_mode<synchronous>, transform_indices = @transform_1, window_bounds = array<i64: 4, 16, 128>}, {pipeline_mode = #tpu.pipeline_mode<synchronous>, transform_indices = @transform_2, window_bounds = array<i64: 1, 128>}, {pipeline_mode = #tpu.pipeline_mode<synchronous>, transform_indices = @transform_3, window_bounds = array<i64: 128, 768>}, {pipeline_mode = #tpu.pipeline_mode<synchronous>, transform_indices = @transform_4, window_bounds = array<i64: 1, 768>}, {transform_indices = @transform_5, window_bounds = array<i64: 5, 8, 384>}, {transform_indices = @transform_6, window_bounds = array<i64: 5, 8, 384>}]} {
    %cst = arith.constant 0.000000e+00 : f32
    %0 = vector.broadcast %cst : f32 to vector<40x128xf32>
    %c0 = arith.constant 0 : index
    %c0_0 = arith.constant 0 : index
    %c0_1 = arith.constant 0 : index
    %1 = vector.load %arg1[%c0, %c0_0, %c0_1] : memref<8x8x16xf32, #tpu.memory_space<vmem>>, vector<5x8x16xf32>
    %2 = vector.shape_cast %1 : vector<5x8x16xf32> to vector<40x16xf32>
    %c0_2 = arith.constant 0 : index
    %c0_3 = arith.constant 0 : index
    %c0_4 = arith.constant 0 : index
    %3 = vector.load %arg2[%c0_2, %c0_3, %c0_4] : memref<4x16x128xf32, #tpu.memory_space<vmem>>, vector<1x16x128xf32>
    %4 = vector.shape_cast %3 : vector<1x16x128xf32> to vector<16x128xf32>
    %cst_5 = arith.constant dense<0.000000e+00> : vector<40x128xf32>
    %5 = tpu.matmul %2, %4, %cst_5 {dimension_numbers = #tpu.dot_dimension_numbers<[1], [0], [0], [1], [0, 0, 1, 1], [], []>} : vector<40x16xf32>, vector<16x128xf32>, vector<40x128xf32> -> vector<40x128xf32>
    %6 = arith.addf %0, %5 : vector<40x128xf32>
    %c1 = arith.constant 1 : index
    %c0_6 = arith.constant 0 : index
    %c0_7 = arith.constant 0 : index
    %7 = vector.load %arg1[%c1, %c0_6, %c0_7] : memref<8x8x16xf32, #tpu.memory_space<vmem>>, vector<5x8x16xf32>
    %8 = vector.shape_cast %7 : vector<5x8x16xf32> to vector<40x16xf32>
    %c1_8 = arith.constant 1 : index
    %c0_9 = arith.constant 0 : index
    %c0_10 = arith.constant 0 : index
    %9 = vector.load %arg2[%c1_8, %c0_9, %c0_10] : memref<4x16x128xf32, #tpu.memory_space<vmem>>, vector<1x16x128xf32>
    %10 = vector.shape_cast %9 : vector<1x16x128xf32> to vector<16x128xf32>
    %cst_11 = arith.constant dense<0.000000e+00> : vector<40x128xf32>
    %11 = tpu.matmul %8, %10, %cst_11 {dimension_numbers = #tpu.dot_dimension_numbers<[1], [0], [0], [1], [0, 0, 1, 1], [], []>} : vector<40x16xf32>, vector<16x128xf32>, vector<40x128xf32> -> vector<40x128xf32>
    %12 = arith.addf %6, %11 : vector<40x128xf32>
    %c2 = arith.constant 2 : index
    %c0_12 = arith.constant 0 : index
    %c0_13 = arith.constant 0 : index
    %13 = vector.load %arg1[%c2, %c0_12, %c0_13] : memref<8x8x16xf32, #tpu.memory_space<vmem>>, vector<5x8x16xf32>
    %14 = vector.shape_cast %13 : vector<5x8x16xf32> to vector<40x16xf32>
    %c2_14 = arith.constant 2 : index
    %c0_15 = arith.constant 0 : index
    %c0_16 = arith.constant 0 : index
    %15 = vector.load %arg2[%c2_14, %c0_15, %c0_16] : memref<4x16x128xf32, #tpu.memory_space<vmem>>, vector<1x16x128xf32>
    %16 = vector.shape_cast %15 : vector<1x16x128xf32> to vector<16x128xf32>
    %cst_17 = arith.constant dense<0.000000e+00> : vector<40x128xf32>
    %17 = tpu.matmul %14, %16, %cst_17 {dimension_numbers = #tpu.dot_dimension_numbers<[1], [0], [0], [1], [0, 0, 1, 1], [], []>} : vector<40x16xf32>, vector<16x128xf32>, vector<40x128xf32> -> vector<40x128xf32>
    %18 = arith.addf %12, %17 : vector<40x128xf32>
    %c3 = arith.constant 3 : index
    %c0_18 = arith.constant 0 : index
    %c0_19 = arith.constant 0 : index
    %19 = vector.load %arg1[%c3, %c0_18, %c0_19] : memref<8x8x16xf32, #tpu.memory_space<vmem>>, vector<5x8x16xf32>
    %20 = vector.shape_cast %19 : vector<5x8x16xf32> to vector<40x16xf32>
    %c3_20 = arith.constant 3 : index
    %c0_21 = arith.constant 0 : index
    %c0_22 = arith.constant 0 : index
    %21 = vector.load %arg2[%c3_20, %c0_21, %c0_22] : memref<4x16x128xf32, #tpu.memory_space<vmem>>, vector<1x16x128xf32>
    %22 = vector.shape_cast %21 : vector<1x16x128xf32> to vector<16x128xf32>
    %cst_23 = arith.constant dense<0.000000e+00> : vector<40x128xf32>
    %23 = tpu.matmul %20, %22, %cst_23 {dimension_numbers = #tpu.dot_dimension_numbers<[1], [0], [0], [1], [0, 0, 1, 1], [], []>} : vector<40x16xf32>, vector<16x128xf32>, vector<40x128xf32> -> vector<40x128xf32>
    %24 = arith.addf %18, %23 : vector<40x128xf32>
    %c0_24 = arith.constant 0 : index
    %c0_25 = arith.constant 0 : index
    %25 = vector.load %arg3[%c0_24, %c0_25] : memref<1x128xf32, #tpu.memory_space<vmem>>, vector<1x128xf32>
    %26 = vector.broadcast %25 : vector<1x128xf32> to vector<40x128xf32>
    %27 = arith.addf %24, %26 : vector<40x128xf32>
    %cst_26 = arith.constant 0.000000e+00 : f32
    %28 = vector.broadcast %cst_26 : f32 to vector<40x128xf32>
    %29 = arith.maximumf %27, %28 : vector<40x128xf32>
    %c0_27 = arith.constant 0 : index
    %c0_28 = arith.constant 0 : index
    %30 = vector.load %arg4[%c0_27, %c0_28] : memref<128x768xf32, #tpu.memory_space<vmem>>, vector<128x768xf32>
    %cst_29 = arith.constant dense<0.000000e+00> : vector<40x768xf32>
    %31 = tpu.matmul %29, %30, %cst_29 {dimension_numbers = #tpu.dot_dimension_numbers<[1], [0], [0], [1], [0, 0, 1, 1], [], []>} : vector<40x128xf32>, vector<128x768xf32>, vector<40x768xf32> -> vector<40x768xf32>
    %c0_30 = arith.constant 0 : index
    %c0_31 = arith.constant 0 : index
    %32 = vector.load %arg5[%c0_30, %c0_31] : memref<1x768xf32, #tpu.memory_space<vmem>>, vector<1x768xf32>
    %33 = vector.broadcast %32 : vector<1x768xf32> to vector<40x768xf32>
    %34 = arith.addf %31, %33 : vector<40x768xf32>
    %35 = vector.extract_strided_slice %34 {offsets = [0, 0], sizes = [40, 384], strides = [1, 1]} : vector<40x768xf32> to vector<40x384xf32>
    %36 = vector.shape_cast %35 : vector<40x384xf32> to vector<5x8x384xf32>
    %c0_32 = arith.constant 0 : index
    %c0_33 = arith.constant 0 : index
    %c0_34 = arith.constant 0 : index
    %37 = vector.load %arg6[%c0_32, %c0_33, %c0_34] : memref<5x8x384xf32, #tpu.memory_space<vmem>>, vector<5x8x384xf32>
    tpu.vector_store %arg6[%c0_32, %c0_33, %c0_34], %36 {strides = array<i32>} : memref<5x8x384xf32, #tpu.memory_space<vmem>>, vector<5x8x384xf32>,
    %38 = vector.extract_strided_slice %34 {offsets = [0, 384], sizes = [40, 384], strides = [1, 1]} : vector<40x768xf32> to vector<40x384xf32>
    %39 = vector.shape_cast %38 : vector<40x384xf32> to vector<5x8x384xf32>
    %c0_35 = arith.constant 0 : index
    %c0_36 = arith.constant 0 : index
    %c0_37 = arith.constant 0 : index
    %40 = vector.load %arg7[%c0_35, %c0_36, %c0_37] : memref<5x8x384xf32, #tpu.memory_space<vmem>>, vector<5x8x384xf32>
    tpu.vector_store %arg7[%c0_35, %c0_36, %c0_37], %39 {strides = array<i32>} : memref<5x8x384xf32, #tpu.memory_space<vmem>>, vector<5x8x384xf32>,
    return
  }
  func.func @transform_0(%arg0: i32) -> (i32, i32, i32) {
    %c0_i32 = arith.constant 0 : i32
    %c0_i32_0 = arith.constant 0 : i32
    %c0_i32_1 = arith.constant 0 : i32
    return %c0_i32, %arg0, %c0_i32_0 : i32, i32, i32
  }
  func.func @transform_1(%arg0: i32) -> (i32, i32, i32) {
    %c0_i32 = arith.constant 0 : i32
    %c0_i32_0 = arith.constant 0 : i32
    %c0_i32_1 = arith.constant 0 : i32
    %c0_i32_2 = arith.constant 0 : i32
    return %c0_i32, %c0_i32_0, %c0_i32_1 : i32, i32, i32
  }
  func.func @transform_2(%arg0: i32) -> (i32, i32) {
    %c0_i32 = arith.constant 0 : i32
    %c0_i32_0 = arith.constant 0 : i32
    %c0_i32_1 = arith.constant 0 : i32
    return %c0_i32, %c0_i32_0 : i32, i32
  }
  func.func @transform_3(%arg0: i32) -> (i32, i32) {
    %c0_i32 = arith.constant 0 : i32
    %c0_i32_0 = arith.constant 0 : i32
    %c0_i32_1 = arith.constant 0 : i32
    return %c0_i32, %c0_i32_0 : i32, i32
  }
  func.func @transform_4(%arg0: i32) -> (i32, i32) {
    %c0_i32 = arith.constant 0 : i32
    %c0_i32_0 = arith.constant 0 : i32
    %c0_i32_1 = arith.constant 0 : i32
    return %c0_i32, %c0_i32_0 : i32, i32
  }
  func.func @transform_5(%arg0: i32) -> (i32, i32, i32) {
    %c0_i32 = arith.constant 0 : i32
    %c0_i32_0 = arith.constant 0 : i32
    %c0_i32_1 = arith.constant 0 : i32
    return %c0_i32, %arg0, %c0_i32_0 : i32, i32, i32
  }
  func.func @transform_6(%arg0: i32) -> (i32, i32, i32) {
    %c0_i32 = arith.constant 0 : i32
    %c0_i32_0 = arith.constant 0 : i32
    %c0_i32_1 = arith.constant 0 : i32
    return %c0_i32, %arg0, %c0_i32_0 : i32, i32, i32
  }
}

</mosaic_0001>

<bundles_post_ra>
// kernel: tpu_custom_call.1
= control target key start
LH: loop header
LB: loop body
LE: loop exit
PB: predicated region body
PF: predicated region fallthrough
CT: control target
= control target key end

     0   :  { %12 = vsyncpa [#allocation3], 0  ;;  %s1632_s0 = inlined_call_operand.hbm [shape: f32[8,8,16], index: 0, kind: input, shape index: {}]   ;;  %s1633_s1 = inlined_call_operand.hbm [shape: f32[4,16,128], index: 1, kind: input, shape index: {}]   ;;  %s1634_s2 = inlined_call_operand.vmem [shape: f32[1,128], index: 2, kind: input, shape index: {}]   ;;  %s1635_s3 = inlined_call_operand.hbm [shape: f32[128,768], index: 3, kind: input, shape index: {}]   ;;  %s1636_s4 = inlined_call_operand.vmem [shape: f32[1,768], index: 4, kind: input, shape index: {}]   ;;  %s1637_s5 = inlined_call_operand.hbm [shape: f32[5,8,384], index: 5, kind: output, shape index: {0}]   ;;  %s1638_s6 = inlined_call_operand.hbm [shape: f32[5,8,384], index: 6, kind: output, shape index: {1}]  }
   0x1   :  { %13 = vsyncpa [#allocation6], 0 }
   0x2   :  { %14 = vsyncpa [#allocation4], 0 }
   0x3   :  { %15 = vsyncpa [#allocation10], 0  ;;  %s1391_s21 = smov [#allocation5]   ;;  %s1392_s23 = smov [#allocation2]  }
   0x4   :  { %s33_s22 = sshll.u32 %s1391_s21, 4  ;;  %s21_s24 = sshll.u32 %s1392_s23, 4  ;;  %s34_s22 = int_to_ptr.vmem [resolvable:$true] %s33_s22  ;;  %s1440_s24 = int_to_ptr.vmem [resolvable:$true] %s21_s24 }
   0x5   :  { %s1273_s27 = scalar_lea.hbm %s1633_s1, 1024 }
   0x6   :  { %p1274_p0 = scmp.ne.s32.totalorder %s1633_s1, %s1273_s27  ;;  %p1277_p1 = scmp.lt.u32.totalorder %s1273_s27, %s1633_s1 }
   0x8   :  { %p1279_p2 = pnand %p1277_p1, %p1274_p0 }
   0xa   :  { %1282 = shalt.err (!%p1279_p2)
}
   0xb   :  { %s1283_s8 = scalar_lea.vmem %s34_s22, 1024  ;;  %p1288_p4 = scmp.lt.s32.totalorder %s34_s22, %s34_s22 }
   0xc   :  { %p1284_p3 = scmp.ne.s32.totalorder %s34_s22, %s1283_s8  ;;  %p1289_p5 = scmp.lt.s32.totalorder %s1283_s8, %s1283_s8 }
   0xe   :  { %p1290_p6 = por %p1289_p5, %p1288_p4 }
  0x10   :  { %p1291_p7 = pnand %p1290_p6, %p1284_p3 }
  0x12   :  { %1294 = shalt.err (!%p1291_p7)
}
  0x13   :  { %s1393_s9 = smov 128   ;;  %s1394_s10 = smov 8  }
  0x14   :  { %39 = dma.hbm_to_vmem [thread:$0]  %s1633_s1, 1024, %s34_s22, [#allocation6], %s1393_s9, %s1393_s9, %s1394_s10  }
  0x15   :  { %s1295_s15 = scalar_lea.hbm %s1632_s0, 1024 }
  0x16   :  { %p1296_p8 = scmp.ne.s32.totalorder %s1632_s0, %s1295_s15  ;;  %p1299_p9 = scmp.lt.u32.totalorder %s1295_s15, %s1632_s0 }
  0x18   :  { %p1301_p10 = pnand %p1299_p9, %p1296_p8 }
  0x1a   :  { %1304 = shalt.err (!%p1301_p10)
}
  0x1b   :  { %s1305_s20 = scalar_lea.vmem %s1440_s24, 1024  ;;  %p1310_p12 = scmp.lt.s32.totalorder %s1440_s24, %s1440_s24 }
  0x1c   :  { %p1306_p11 = scmp.ne.s32.totalorder %s1440_s24, %s1305_s20  ;;  %p1311_p13 = scmp.lt.s32.totalorder %s1305_s20, %s1305_s20 }
  0x1e   :  { %p1312_p0 = por %p1311_p13, %p1310_p12 }
  0x20   :  { %p1313_p1 = pnand %p1312_p0, %p1306_p11 }
  0x22   :  { %1316 = shalt.err (!%p1313_p1)
}
  0x23   :  { %27 = dma.hbm_to_vmem [thread:$0]  %s1632_s0, 1024, %s1440_s24, [#allocation3], %s1393_s9, %s1393_s9, %s1394_s10  }
  0x24   :  { %s1395_s22 = smov [#allocation7]   ;;  %s1317_s27 = scalar_lea.hbm %s1635_s3, 12288 }
  0x25   :  { %s47_s23 = sshll.u32 %s1395_s22, 4  ;;  %p1318_p2 = scmp.ne.s32.totalorder %s1635_s3, %s1317_s27  ;;  %s48_s23 = int_to_ptr.vmem [resolvable:$true] %s47_s23 }
  0x26   :  { %p1321_p3 = scmp.lt.u32.totalorder %s1317_s27, %s1635_s3 }
  0x28   :  { %p1323_p4 = pnand %p1321_p3, %p1318_p2 }
  0x2a   :  { %1326 = shalt.err (!%p1323_p4)
}
  0x2b   :  { %s1327_s8 = scalar_lea.vmem %s48_s23, 12288  ;;  %p1332_p6 = scmp.lt.s32.totalorder %s48_s23, %s48_s23 }
  0x2c   :  { %p1328_p5 = scmp.ne.s32.totalorder %s48_s23, %s1327_s8  ;;  %p1333_p7 = scmp.lt.s32.totalorder %s1327_s8, %s1327_s8 }
  0x2e   :  { %p1334_p8 = por %p1333_p7, %p1332_p6 }
  0x30   :  { %p1335_p9 = pnand %p1334_p8, %p1328_p5 }
  0x32   :  { %1338 = shalt.err (!%p1335_p9)
}
  0x33   :  { %s1396_s0 = smov 768   ;;  %s1397_s24 = smov 48  }
  0x34   :  { %53 = dma.hbm_to_vmem [thread:$0]  %s1635_s3, 12288, %s48_s23, [#allocation6], %s1396_s0, %s1396_s0, %s1397_s24  }
  0x35   :  { %1383 = dma.done.wait [#allocation3], 1024  }
  0x36   :  { %1384 = vsyncadd [#allocation3], 4294966272 }
  0x37   :  { %1385 = dma.done.wait [#allocation6], 13312  }
  0x38   :  { %1386 = vsyncadd [#allocation6], 4294953984  ;;  %v1398_v0 = vmov 0.0|0.0   ;;  %vm1399_vm0 = vmmov 0   ;;  %v1400_v1 = vmov 0.0   ;;  %v79_v2 = vld [vmem:[#allocation5 + $0x10] sm:$0xff] }
  0x39   :  { %1257 = vmatprep.subr.bf16.mxu1 %v1398_v0  ;;  %1080 = vmatprep.mubr.msk.f32.mxu1 %vm1399_vm0, %v1400_v1  ;;  %v80_v3 = vld [vmem:[#allocation5 + $0x18] sm:$0xff]  ;;  %v70_v5 = vld [vmem:[#allocation5] sm:$0xff]  ;;  %v71_v6 = vld [vmem:[#allocation5 + $0x8] sm:$0xff]  ;;  %vm81_vm1 = vcmask 130048  }
  0x3a   :  { %1149 = vmatprep.subr.bf16.mxu0 %v1398_v0  ;;  %1077 = vmatprep.mubr.msk.f32.mxu0 %vm1399_vm0, %v1400_v1  ;;  %v1150_v4 = vpack.c.bf16 %v80_v3, %v79_v2  ;;  %v74_v7 = vld [vmem:[#allocation2 + $0x10] sm:$0xff]  ;;  %v1153_v8 = vpack.c.bf16 %v71_v6, %v70_v5  ;;  %v73_v9 = vld [vmem:[#allocation2 + $0x8] sm:$0xff]  ;;  %v299_v10 = vld [vmem:[#allocation5 + $0x20] sm:$0xff] }
  0x3b   :  { %v300_v11 = vld [vmem:[#allocation5 + $0x28] sm:$0xff]  ;;  %v75_v13 = vld [vmem:[#allocation2 + $0x18] sm:$0xff]  ;;  %v76_v14 = vld [vmem:[#allocation2 + $0x20] sm:$0xff] }
  0x3c   :  { %1258 = vmatpush3.bf16.msra.mxu1 %v1150_v4  ;;  %1151 = vmatpush3.bf16.msra.mxu0 %v1150_v4  ;;  %v1156_v12 = vpack.c.bf16 %v300_v11, %v299_v10  ;;  %v77_v15 = vld [vmem:[#allocation2 + $0x28] sm:$0xff]  ;;  %v418_v16 = vld [vmem:[#allocation5 + $0x30] sm:$0xff]  ;;  %v419_v17 = vld [vmem:[#allocation5 + $0x38] sm:$0xff] }
  0x3d   :  { %1152 = vmatprep.subr.bf16.mxu1 %v1398_v0  ;;  %1155 = vmatprep.subr.bf16.mxu0 %v1398_v0  ;;  %v65_v18 = vld [vmem:[#allocation2] sm:$0xff]  ;;  %v1159_v19 = vpack.c.bf16 %v419_v17, %v418_v16  ;;  %v297_v20 = vld [vmem:[#allocation2 + $0x30] sm:$0xff]  ;;  %v416_v21 = vld [vmem:[#allocation2 + $0x38] sm:$0xff] }
  0x3e   :  { %v548_v22 = vld [vmem:[#allocation7 + $0x8] sm:$0xff]  ;;  %v554_v23 = vld [vmem:[#allocation7 + $0x38] sm:$0xff]  ;;  %v547_v25 = vld [vmem:[#allocation7] sm:$0xff] }
  0x3f   :  { %1081 = vmatmul.mubr.msk.f32.vlgmr.msra.gmra.mrb[0].mxu1 %vm81_vm1, %v74_v7  ;;  %1078 = vmatmul.mubr.msk.f32.vlgmr.msra.gmra.mrb[0].mxu0 %vm81_vm1, %v73_v9  ;;  %v1161_v24 = vpack.c.bf16 %v554_v23, %v548_v22  ;;  %v553_v26 = vld [vmem:[#allocation7 + $0x30] sm:$0xff]  ;;  %v550_v27 = vld [vmem:[#allocation7 + $0x18] sm:$0xff]  ;;  %v556_v29 = vld [vmem:[#allocation7 + $0x48] sm:$0xff] }
  0x40   :  { %1154 = vmatpush3.bf16.msra.mxu1 %v1153_v8  ;;  %1083 = vmatprep.mubr.msk.f32.mxu1 %vm1399_vm0, %v1400_v1  ;;  %v1163_v28 = vpack.c.bf16 %v553_v26, %v547_v25  ;;  %v549_v30 = vld [vmem:[#allocation7 + $0x10] sm:$0xff]  ;;  %v555_v31 = vld [vmem:[#allocation7 + $0x40] sm:$0xff]  ;;  %v1193_v32 = vpack.c.bf16 %v556_v29, %v550_v27  ;;  %v560_v34 = vld [vmem:[#allocation7 + $0x68] sm:$0xff] }
  0x41   :  { %1157 = vmatpush3.bf16.msra.mxu0 %v1156_v12  ;;  %1158 = vmatprep.subr.bf16.mxu1 %v1398_v0  ;;  %v1195_v33 = vpack.c.bf16 %v555_v31, %v549_v30  ;;  %v566_v35 = vld [vmem:[#allocation7 + $0x98] sm:$0xff]  ;;  %v559_v37 = vld [vmem:[#allocation7 + $0x60] sm:$0xff]  ;;  %v565_v38 = vld [vmem:[#allocation7 + $0x90] sm:$0xff] }
  0x42   :  { %1115 = vmatprep.mubr.msk.f32.mxu0 %vm1399_vm0, %v1400_v1  ;;  %1162 = vmatprep.subr.bf16.mxu0 %v1161_v24  ;;  %v1165_v36 = vpack.c.bf16 %v566_v35, %v560_v34  ;;  %v562_v39 = vld [vmem:[#allocation7 + $0x78] sm:$0xff]  ;;  %v1167_v40 = vpack.c.bf16 %v565_v38, %v559_v37  ;;  %v568_v41 = vld [vmem:[#allocation7 + $0xa8] sm:$0xff]  ;;  %v561_v42 = vld [vmem:[#allocation7 + $0x70] sm:$0xff] }
  0x43   :  { %1084 = vmatmul.mubr.msk.f32.gmra.mrb[2].mxu1 %vm81_vm1, %v75_v13  ;;  %v567_v43 = vld [vmem:[#allocation7 + $0xa0] sm:$0xff]  ;;  %v1197_v44 = vpack.c.bf16 %v568_v41, %v562_v39  ;;  %v572_v46 = vld [vmem:[#allocation7 + $0xc8] sm:$0xff]  ;;  %v578_v47 = vld [vmem:[#allocation7 + $0xf8] sm:$0xff] }
  0x44   :  { %1086 = vmatprep.mubr.msk.f32.mxu1 %vm1399_vm0, %v1400_v1  ;;  %1116 = vmatmul.mubr.msk.f32.vlgmr.msra.gmra.mrb[2].mxu0 %vm81_vm1, %v74_v7  ;;  %v1199_v45 = vpack.c.bf16 %v567_v43, %v561_v42  ;;  %v1169_v48 = vpack.c.bf16 %v578_v47, %v572_v46  ;;  %v571_v49 = vld [vmem:[#allocation7 + $0xc0] sm:$0xff]  ;;  %v577_v50 = vld [vmem:[#allocation7 + $0xf0] sm:$0xff]  ;;  %v574_v51 = vld [vmem:[#allocation7 + $0xd8] sm:$0xff] }
  0x45   :  { %1118 = vmatprep.mubr.msk.f32.mxu0 %vm1399_vm0, %v1400_v1  ;;  %1164 = vmatpush1.bf16.msra.mxu0 %v1163_v28  ;;  %v1171_v52 = vpack.c.bf16 %v577_v50, %v571_v49  ;;  %v580_v53 = vld [vmem:[#allocation7 + $0x108] sm:$0xff]  ;;  %v573_v54 = vld [vmem:[#allocation7 + $0xd0] sm:$0xff]  ;;  %v579_v55 = vld [vmem:[#allocation7 + $0x100] sm:$0xff] }
  0x46   :  { %1166 = vmatprep.subr.bf16.mxu0 %v1165_v36  ;;  %v1201_v56 = vpack.c.bf16 %v580_v53, %v574_v51  ;;  %v1203_v57 = vpack.c.bf16 %v579_v55, %v573_v54  ;;  %v584_v58 = vld [vmem:[#allocation7 + $0x128] sm:$0xff]  ;;  %v590_v59 = vld [vmem:[#allocation7 + $0x158] sm:$0xff]  ;;  %v583_v61 = vld [vmem:[#allocation7 + $0x120] sm:$0xff] }
  0x47   :  { %1087 = vmatmul.mubr.msk.f32.gmra.mrb[4].mxu1 %vm81_vm1, %v76_v14  ;;  %v1173_v60 = vpack.c.bf16 %v590_v59, %v584_v58  ;;  %v589_v62 = vld [vmem:[#allocation7 + $0x150] sm:$0xff]  ;;  %v586_v63 = vld [vmem:[#allocation7 + $0x138] sm:$0xff]  ;;  %v592_v2 = vld [vmem:[#allocation7 + $0x168] sm:$0xff] }
  0x48   :  { %1089 = vmatprep.mubr.msk.f32.mxu1 %vm1399_vm0, %v1400_v1  ;;  %1119 = vmatmul.mubr.msk.f32.gmra.mrb[4].mxu0 %vm81_vm1, %v75_v13  ;;  %v1175_v0 = vpack.c.bf16 %v589_v62, %v583_v61  ;;  %v585_v3 = vld [vmem:[#allocation7 + $0x130] sm:$0xff]  ;;  %v591_v4 = vld [vmem:[#allocation7 + $0x160] sm:$0xff]  ;;  %v1205_v5 = vpack.c.bf16 %v592_v2, %v586_v63  ;;  %v602_v8 = vld [vmem:[#allocation7 + $0x1b8] sm:$0xff] }
  0x49   :  { %1121 = vmatprep.mubr.msk.f32.mxu0 %vm1399_vm0, %v1400_v1  ;;  %1168 = vmatpush1.bf16.msra.mxu0 %v1167_v40  ;;  %v1207_v6 = vpack.c.bf16 %v591_v4, %v585_v3  ;;  %v595_v10 = vld [vmem:[#allocation7 + $0x180] sm:$0xff]  ;;  %v601_v11 = vld [vmem:[#allocation7 + $0x1b0] sm:$0xff]  ;;  %v598_v12 = vld [vmem:[#allocation7 + $0x198] sm:$0xff] }
  0x4a   :  { %1170 = vmatprep.subr.bf16.mxu0 %v1169_v48  ;;  %v603_v16 = vld [vmem:[#allocation7 + $0x1c0] sm:$0xff]  ;;  %v613_v23 = vld [vmem:[#allocation7 + $0x210] sm:$0xff]  ;;  %v610_v24 = vld [vmem:[#allocation7 + $0x1f8] sm:$0xff] }
  0x4b   :  { %1090 = vmatmul.mubr.msk.f32.gmra.mrb[6].mxu1 %vm81_vm1, %v77_v15  ;;  %v607_v22 = vld [vmem:[#allocation7 + $0x1e0] sm:$0xff]  ;;  %v616_v26 = vld [vmem:[#allocation7 + $0x228] sm:$0xff]  ;;  %v609_v27 = vld [vmem:[#allocation7 + $0x1f0] sm:$0xff] }
  0x4c   :  { %1096 = vmatprep.mubr.msk.f32.mxu1 %vm1399_vm0, %v1400_v1  ;;  %1122 = vmatmul.mubr.msk.f32.gmra.mrb[6].mxu0 %vm81_vm1, %v76_v14  ;;  %v1183_v25 = vpack.c.bf16 %v613_v23, %v607_v22  ;;  %v615_v28 = vld [vmem:[#allocation7 + $0x220] sm:$0xff]  ;;  %v1213_v29 = vpack.c.bf16 %v616_v26, %v610_v24  ;;  %v620_v31 = vld [vmem:[#allocation7 + $0x248] sm:$0xff]  ;;  %v625_v35 = vld [vmem:[#allocation7 + $0x270] sm:$0xff] }
  0x4d   :  { %1124 = vmatprep.mubr.msk.f32.mxu0 %vm1399_vm0, %v1400_v1  ;;  %1172 = vmatpush1.bf16.msra.mxu0 %v1171_v52  ;;  %v1215_v30 = vpack.c.bf16 %v615_v28, %v609_v27  ;;  %v619_v34 = vld [vmem:[#allocation7 + $0x240] sm:$0xff]  ;;  %v622_v36 = vld [vmem:[#allocation7 + $0x258] sm:$0xff]  ;;  %v628_v38 = vld [vmem:[#allocation7 + $0x288] sm:$0xff] }
  0x4e   :  { %1174 = vmatprep.subr.bf16.mxu0 %v1173_v60  ;;  %v1187_v37 = vpack.c.bf16 %v625_v35, %v619_v34  ;;  %v621_v39 = vld [vmem:[#allocation7 + $0x250] sm:$0xff]  ;;  %v627_v40 = vld [vmem:[#allocation7 + $0x280] sm:$0xff]  ;;  %v1217_v41 = vpack.c.bf16 %v628_v38, %v622_v36  ;;  %v632_v43 = vld [vmem:[#allocation7 + $0x2a8] sm:$0xff] }
  0x4f   :  { %1097 = vmatmul.mubr.msk.f32.vlgmr.msra.gmra.mrb[8].mxu1 %vm81_vm1, %v65_v18  ;;  %v1219_v42 = vpack.c.bf16 %v627_v40, %v621_v39  ;;  %v631_v46 = vld [vmem:[#allocation7 + $0x2a0] sm:$0xff]  ;;  %v637_v47 = vld [vmem:[#allocation7 + $0x2d0] sm:$0xff]  ;;  %v634_v48 = vld [vmem:[#allocation7 + $0x2b8] sm:$0xff] }
  0x50   :  { %1160 = vmatpush3.bf16.msra.mxu1 %v1159_v19  ;;  %1099 = vmatprep.mubr.msk.f32.mxu1 %vm1399_vm0, %v1400_v1  ;;  %v608_v19 = vld [vmem:[#allocation7 + $0x1e8] sm:$0xff]  ;;  %v1191_v49 = vpack.c.bf16 %v637_v47, %v631_v46  ;;  %v633_v51 = vld [vmem:[#allocation7 + $0x2b0] sm:$0xff]  ;;  %v639_v53 = vld [vmem:[#allocation7 + $0x2e0] sm:$0xff] }
  0x51   :  { %1125 = vmatmul.mubr.msk.f32.gmra.mrb[8].mxu0 %vm81_vm1, %v77_v15  ;;  %1194 = vmatprep.subr.bf16.mxu1 %v1193_v32  ;;  %v626_v32 = vld [vmem:[#allocation7 + $0x278] sm:$0xff]  ;;  %v640_v50 = vld [vmem:[#allocation7 + $0x2e8] sm:$0xff]  ;;  %v1223_v54 = vpack.c.bf16 %v639_v53, %v633_v51  ;;  %v1548_v36 = vld [vmem:[%s1634_s2] ss:$0 sm:$0xff] }
  0x52   :  { %1127 = vmatprep.mubr.msk.f32.mxu0 %vm1399_vm0, %v1400_v1  ;;  %1176 = vmatpush1.bf16.msra.mxu0 %v1175_v0  ;;  %v1221_v52 = vpack.c.bf16 %v640_v50, %v634_v48  ;;  %v552_v55 = vld [vmem:[#allocation7 + $0x28] sm:$0xff]  ;;  %v551_v39 = vld [vmem:[#allocation7 + $0x20] sm:$0xff]  ;;  %v557_v40 = vld [vmem:[#allocation7 + $0x50] sm:$0xff] }
  0x53   :  { %1100 = vmatmul.mubr.msk.f32.gmra.mrb[10].mxu1 %vm81_vm1, %v73_v9  ;;  %v563_v50 = vld [vmem:[#allocation7 + $0x80] sm:$0xff]  ;;  %v569_v51 = vld [vmem:[#allocation7 + $0xb0] sm:$0xff]  ;;  %v582_v53 = vld [vmem:[#allocation7 + $0x118] sm:$0xff] }
  0x54   :  { %1102 = vmatprep.mubr.msk.f32.mxu1 %vm1399_vm0, %v1400_v1 }
  0x55   :  { %1128 = vmatmul.mubr.msk.f32.gmra.mrb[10].mxu0 %vm81_vm1, %v297_v20 }
  0x56   :  { %739 = vmatprep.mubr.f32.mxu0 %v1400_v1 }
  0x57   :  { %1103 = vmatmul.mubr.msk.f32.gmra.mrb[12].mxu1 %vm81_vm1, %v74_v7  ;;  %v596_v7 = vld [vmem:[#allocation7 + $0x188] sm:$0xff] }
  0x58   :  { %1105 = vmatprep.mubr.msk.f32.mxu1 %vm1399_vm0, %v1400_v1  ;;  %v1177_v9 = vpack.c.bf16 %v602_v8, %v596_v7 }
  0x5a   :  { %1178 = vmatprep.subr.bf16.mxu0 %v1177_v9 }
  0x5b   :  { %1106 = vmatmul.mubr.msk.f32.gmra.mrb[14].mxu1 %vm81_vm1, %v75_v13 }
  0x5c   :  { %1108 = vmatprep.mubr.msk.f32.mxu1 %vm1399_vm0, %v1400_v1 }
  0x5f   :  { %1109 = vmatmul.mubr.msk.f32.gmra.mrb[16].mxu1 %vm81_vm1, %v76_v14 }
  0x60   :  { %1134 = vmatprep.mubr.msk.f32.mxu1 %vm1399_vm0, %v1400_v1 }
  0x63   :  { %1135 = vmatmul.mubr.msk.f32.vlgmr.msra.gmra.mrb[18].mxu1 %vm81_vm1, %v75_v13  ;;  %v1179_v13 = vpack.c.bf16 %v601_v11, %v595_v10 }
  0x64   :  { %1137 = vmatprep.mubr.msk.f32.mxu1 %vm1399_vm0, %v1400_v1  ;;  %1196 = vmatpush1.bf16.msra.mxu1 %v1195_v33  ;;  %v1185_v33 = vpack.c.bf16 %v626_v32, %v620_v31 }
  0x65   :  { %1198 = vmatprep.subr.bf16.mxu1 %v1197_v44  ;;  %1180 = vmatpush1.bf16.msra.mxu0 %v1179_v13  ;;  %v638_v44 = vld [vmem:[#allocation7 + $0x2d8] sm:$0xff] }
  0x67   :  { %1138 = vmatmul.mubr.msk.f32.gmra.mrb[20].mxu1 %vm81_vm1, %v76_v14  ;;  %v604_v14 = vld [vmem:[#allocation7 + $0x1c8] sm:$0xff] }
  0x68   :  { %1140 = vmatprep.mubr.msk.f32.mxu1 %vm1399_vm0, %v1400_v1  ;;  %1200 = vmatpush1.bf16.msra.mxu1 %v1199_v45  ;;  %v1209_v17 = vpack.c.bf16 %v604_v14, %v598_v12  ;;  %v1189_v45 = vpack.c.bf16 %v638_v44, %v632_v43 }
  0x69   :  { %1202 = vmatprep.subr.bf16.mxu1 %v1201_v56  ;;  %v558_v56 = vld [vmem:[#allocation7 + $0x58] sm:$0xff] }
  0x6b   :  { %1141 = vmatmul.mubr.msk.f32.gmra.mrb[22].mxu1 %vm81_vm1, %v77_v15  ;;  %v597_v15 = vld [vmem:[#allocation7 + $0x190] sm:$0xff] }
  0x6c   :  { %1143 = vmatprep.mubr.msk.f32.mxu1 %vm1399_vm0, %v1400_v1  ;;  %1204 = vmatpush1.bf16.msra.mxu1 %v1203_v57  ;;  %v1211_v18 = vpack.c.bf16 %v603_v16, %v597_v15  ;;  %v1225_v57 = vpack.c.bf16 %v558_v56, %v552_v55  ;;  %v1231_v56 = vpack.c.bf16 %v569_v51, %v563_v50 }
  0x6d   :  { %1206 = vmatprep.subr.bf16.mxu1 %v1205_v5 }
  0x6f   :  { %1144 = vmatmul.mubr.msk.f32.gmra.mrb[24].mxu1 %vm81_vm1, %v297_v20  ;;  %v614_v20 = vld [vmem:[#allocation7 + $0x218] sm:$0xff] }
  0x70   :  { %1146 = vmatprep.mubr.msk.f32.mxu1 %vm1399_vm0, %v1400_v1  ;;  %1208 = vmatpush1.bf16.msra.mxu1 %v1207_v6 }
  0x71   :  { %1210 = vmatprep.subr.bf16.mxu1 %v1209_v17 }
  0x73   :  { %1147 = vmatmul.mubr.msk.f32.gmra.mrb[26].mxu1 %vm81_vm1, %v416_v21  ;;  %v1181_v21 = vpack.c.bf16 %v614_v20, %v608_v19 }
  0x74   :  { %834 = vmatprep.mubr.f32.mxu1 %v1400_v1  ;;  %1212 = vmatpush1.bf16.msra.mxu1 %v1211_v18 }
  0x75   :  { %1182 = vmatprep.subr.bf16.mxu0 %v1181_v21  ;;  %1214 = vmatprep.subr.bf16.mxu1 %v1213_v29 }
  0x76   :  { %1184 = vmatpush1.bf16.msra.mxu0 %v1183_v25 }
  0x77   :  { %1186 = vmatprep.subr.bf16.mxu0 %v1185_v33 }
  0x78   :  { %1216 = vmatpush1.bf16.msra.mxu1 %v1215_v30 }
  0x79   :  { %1218 = vmatprep.subr.bf16.mxu1 %v1217_v41  ;;  %v564_v41 = vld [vmem:[#allocation7 + $0x88] sm:$0xff] }
  0x7a   :  { %1188 = vmatpush1.bf16.msra.mxu0 %v1187_v37 }
  0x7b   :  { %1190 = vmatprep.subr.bf16.mxu0 %v1189_v45  ;;  %v1227_v45 = vpack.c.bf16 %v557_v40, %v551_v39  ;;  %v635_v40 = vld [vmem:[#allocation7 + $0x2c0] sm:$0xff] }
  0x7c   :  { %1220 = vmatpush1.bf16.msra.mxu1 %v1219_v42  ;;  %v570_v42 = vld [vmem:[#allocation7 + $0xb8] sm:$0xff] }
  0x7d   :  { %1222 = vmatprep.subr.bf16.mxu1 %v1221_v52  ;;  %v576_v52 = vld [vmem:[#allocation7 + $0xe8] sm:$0xff] }
  0x7e   :  { %1192 = vmatpush1.bf16.msra.mxu0 %v1191_v49  ;;  %v1229_v49 = vpack.c.bf16 %v570_v42, %v564_v41  ;;  %v641_v41 = vld [vmem:[#allocation7 + $0x2f0] sm:$0xff] }
  0x7f   :  { %1226 = vmatprep.subr.bf16.mxu0 %v1225_v57  ;;  %v1255_v42 = vpack.c.bf16 %v641_v41, %v635_v40 }
  0x80   :  { %1224 = vmatpush1.bf16.msra.mxu1 %v1223_v54 }
 0x112   :  { %v168_v58 = vpop.f32.mrb[0].mxu1  ;;  %v163_v59 = vpop.f32.mrb[0].mxu0 }
 0x113   :  { %v1082_v60 = vpop.f32.mrb[1].mxu1  ;;  %v1079_v61 = vpop.f32.mrb[1].mxu0 }
 0x114   :  { %v1233_v60 = vpack.c.bf16 %v582_v53, %v576_v52  ;;  %v575_v61 = vld [vmem:[#allocation7 + $0xe0] sm:$0xff] }
 0x116   :  { %v173_v62 = vpop.f32.mrb[2].mxu1 }
 0x117   :  { %v1085_v63 = vpop.f32.mrb[3].mxu1  ;;  %v382_v0 = vpop.f32.mrb[2].mxu0 }
 0x118   :  { %v1117_v2 = vpop.f32.mrb[3].mxu0  ;;  %v588_v63 = vld [vmem:[#allocation7 + $0x148] sm:$0xff] }
 0x11a   :  { %v178_v3 = vpop.f32.mrb[4].mxu1 }
 0x11b   :  { %v1088_v4 = vpop.f32.mrb[5].mxu1  ;;  %v387_v5 = vpop.f32.mrb[4].mxu0 }
 0x11c   :  { %v1120_v6 = vpop.f32.mrb[5].mxu0 }
 0x11e   :  { %v183_v7 = vpop.f32.mrb[6].mxu1 }
 0x11f   :  { %v1091_v8 = vpop.f32.mrb[7].mxu1  ;;  %v392_v9 = vpop.f32.mrb[6].mxu0 }
 0x120   :  { %v1123_v10 = vpop.f32.mrb[7].mxu0 }
 0x121   :  { %v593_v10 = vld [vmem:[#allocation7 + $0x170] sm:$0xff] }
 0x122   :  { %v268_v11 = vpop.f32.mrb[8].mxu1 }
 0x123   :  { %v269_v12 = vadd.f32 %v268_v11, %v163_v59  ;;  %v1098_v13 = vpop.f32.mrb[9].mxu1  ;;  %v600_v11 = vld [vmem:[#allocation7 + $0x1a8] sm:$0xff] }
 0x124   :  { %v397_v14 = vpop.f32.mrb[8].mxu0 }
 0x125   :  { %v406_v15 = vadd.f32 %v382_v0, %v269_v12  ;;  %v1126_v16 = vpop.f32.mrb[9].mxu0  ;;  %v594_v0 = vld [vmem:[#allocation7 + $0x178] sm:$0xff] }
 0x126   :  { %v273_v17 = vpop.f32.mrb[10].mxu1  ;;  %v1237_v8 = vpack.c.bf16 %v594_v0, %v588_v63  ;;  %v606_v12 = vld [vmem:[#allocation7 + $0x1d8] sm:$0xff] }
 0x127   :  { %v274_v18 = vadd.f32 %v273_v17, %v168_v58  ;;  %v1101_v19 = vpop.f32.mrb[11].mxu1 }
 0x128   :  { %v402_v20 = vpop.f32.mrb[10].mxu0  ;;  %v599_v19 = vld [vmem:[#allocation7 + $0x1a0] sm:$0xff] }
 0x129   :  { %v407_v21 = vadd.f32 %v387_v5, %v274_v18  ;;  %v1129_v22 = vpop.f32.mrb[11].mxu0  ;;  %v1241_v18 = vpack.c.bf16 %v606_v12, %v600_v11 }
 0x12a   :  { %v278_v23 = vpop.f32.mrb[12].mxu1  ;;  %v612_v22 = vld [vmem:[#allocation7 + $0x208] sm:$0xff] }
 0x12b   :  { %v279_v24 = vadd.f32 %v278_v23, %v173_v62  ;;  %v1104_v25 = vpop.f32.mrb[13].mxu1  ;;  %v581_v62 = vld [vmem:[#allocation7 + $0x110] sm:$0xff]  ;;  %v618_v23 = vld [vmem:[#allocation7 + $0x238] sm:$0xff] }
 0x12c   :  { %v1235_v4 = vpack.c.bf16 %v581_v62, %v575_v61 }
 0x12d   :  { %v408_v26 = vadd.f32 %v392_v9, %v279_v24  ;;  %v587_v9 = vld [vmem:[#allocation7 + $0x140] sm:$0xff] }
 0x12e   :  { %v283_v27 = vpop.f32.mrb[14].mxu1 }
 0x12f   :  { %v284_v28 = vadd.f32 %v283_v27, %v178_v3  ;;  %v1107_v29 = vpop.f32.mrb[15].mxu1  ;;  %v1245_v27 = vpack.c.bf16 %v618_v23, %v612_v22 }
 0x130   :  { %v617_v29 = vld [vmem:[#allocation7 + $0x230] sm:$0xff] }
 0x131   :  { %v409_v30 = vadd.f32 %v397_v14, %v284_v28  ;;  %v611_v28 = vld [vmem:[#allocation7 + $0x200] sm:$0xff] }
 0x132   :  { %v288_v31 = vpop.f32.mrb[16].mxu1 }
 0x133   :  { %v289_v32 = vadd.f32 %v288_v31, %v183_v7  ;;  %v1110_v33 = vpop.f32.mrb[17].mxu1  ;;  %v630_v31 = vld [vmem:[#allocation7 + $0x298] sm:$0xff] }
 0x135   :  { %v410_v34 = vadd.f32 %v402_v20, %v289_v32  ;;  %v605_v20 = vld [vmem:[#allocation7 + $0x1d0] sm:$0xff]  ;;  %v1247_v32 = vpack.c.bf16 %v617_v29, %v611_v28 }
 0x136   :  { %v501_v35 = vpop.f32.mrb[18].mxu1  ;;  %v1243_v25 = vpack.c.bf16 %v605_v20, %v599_v19 }
 0x137   :  { %v525_v37 = vadd.f32 %v501_v35, %v406_v15  ;;  %v1136_v38 = vpop.f32.mrb[19].mxu1  ;;  %v1239_v15 = vpack.c.bf16 %v593_v10, %v587_v9  ;;  %v629_v35 = vld [vmem:[#allocation7 + $0x290] sm:$0xff] }
 0x139   :  { %v537_v43 = vadd.f32 %v1548_v36, %v525_v37  ;;  %v642_v37 = vld [vmem:[#allocation7 + $0x2f8] sm:$0xff] }
 0x13a   :  { %v506_v44 = vpop.f32.mrb[20].mxu1 }
 0x13b   :  { %v1551_v46 = vmax.f32 %v537_v43, 0.0  ;;  %v526_v47 = vadd.f32 %v506_v44, %v407_v21  ;;  %v1139_v48 = vpop.f32.mrb[21].mxu1  ;;  %v645_v43 = vlaneseq }
 0x13d   :  { %v538_v54 = vadd.f32 %v1548_v36, %v526_v47  ;;  %740 = vmatmul.mubr.f32.vlgmr.msra.gmra.mrb[12].mxu0 %v1551_v46  ;;  %835 = vmatmul.mubr.f32.vlgmr.msra.gmra.mrb[28].mxu1 %v1551_v46  ;;  %v1583_v44 = vshrl.u32 %v645_v43, 7  ;;  %v1590_v47 = vld [vmem:[%s1636_s4] sm:$0x3f]  ;;  %s1401_s4 = smov [#allocation8]  }
 0x13e   :  { %1228 = vmatpush1.bf16.msra.mxu0 %v1227_v45  ;;  %v511_v55 = vpop.f32.mrb[22].mxu1  ;;  %745 = vmatprep.mubr.f32.mxu0 %v1400_v1  ;;  %s995_s13 = sshll.u32 %s1401_s4, 4  ;;  %s996_s13 = int_to_ptr.vmem [resolvable:$true] %s995_s13 }
 0x13f   :  { %v1557_v57 = vmax.f32 %v538_v54, 0.0  ;;  %v527_v58 = vadd.f32 %v511_v55, %v408_v26  ;;  %840 = vmatprep.mubr.f32.mxu1 %v1400_v1  ;;  %1230 = vmatprep.subr.bf16.mxu0 %v1229_v49  ;;  %v1142_v59 = vpop.f32.mrb[23].mxu1  ;;  %v647_v45 = vsub.s32 0, %v1583_v44  ;;  %v651_v48 = vsub.s32 1, %v1583_v44  ;;  %s1339_s14 = scalar_lea.vmem %s996_s13, 1920  ;;  %p1344_p11 = scmp.lt.s32.totalorder %s996_s13, %s996_s13 }
 0x140   :  { %v659_v49 = vsub.s32 3, %v1583_v44  ;;  %p1340_p10 = scmp.ne.s32.totalorder %s996_s13, %s1339_s14  ;;  %p1345_p12 = scmp.lt.s32.totalorder %s1339_s14, %s1339_s14 }
 0x141   :  { %v539_v2 = vadd.f32 %v1548_v36, %v527_v58  ;;  %746 = vmatmul.mubr.f32.gmra.mrb[14].mxu0 %v1557_v57  ;;  %841 = vmatmul.mubr.f32.gmra.mrb[30].mxu1 %v1557_v57  ;;  %v648_v50 = vrot.slane %v1590_v47, %v647_v45  ;;  %v652_v51 = vrot.slane %v1590_v47, %v651_v48 }
 0x142   :  { %1232 = vmatpush1.bf16.msra.mxu0 %v1231_v56  ;;  %v516_v3 = vpop.f32.mrb[24].mxu1  ;;  %751 = vmatprep.mubr.f32.mxu0 %v1400_v1  ;;  %v660_v52 = vrot.slane %v1590_v47, %v659_v49  ;;  %p1346_p13 = por %p1345_p12, %p1344_p11 }
 0x143   :  { %v1564_v5 = vmax.f32 %v539_v2, 0.0  ;;  %v528_v6 = vadd.f32 %v516_v3, %v409_v30  ;;  %846 = vmatprep.mubr.f32.mxu1 %v1400_v1  ;;  %1234 = vmatprep.subr.bf16.mxu0 %v1233_v60  ;;  %v1145_v7 = vpop.f32.mrb[25].mxu1  ;;  %v624_v30 = vld [vmem:[#allocation7 + $0x268] sm:$0xff] }
 0x144   :  { %v1249_v33 = vpack.c.bf16 %v630_v31, %v624_v30  ;;  %p1347_p0 = pnand %p1346_p13, %p1340_p10 }
 0x145   :  { %v540_v13 = vadd.f32 %v1548_v36, %v528_v6  ;;  %752 = vmatmul.mubr.f32.gmra.mrb[16].mxu0 %v1564_v5  ;;  %847 = vmatmul.mubr.f32.gmra.mrb[32].mxu1 %v1564_v5 }
 0x146   :  { %1236 = vmatpush1.bf16.msra.mxu0 %v1235_v4  ;;  %v521_v14 = vpop.f32.mrb[26].mxu1  ;;  %757 = vmatprep.mubr.f32.mxu0 %v1400_v1 }
 0x147   :  { %v545_v16 = vmax.f32 %v540_v13, 0.0  ;;  %v529_v17 = vadd.f32 %v521_v14, %v410_v34  ;;  %852 = vmatprep.mubr.f32.mxu1 %v1400_v1  ;;  %1238 = vmatprep.subr.bf16.mxu0 %v1237_v8  ;;  %v1148_v21 = vpop.f32.mrb[27].mxu1  ;;  %v623_v34 = vld [vmem:[#allocation7 + $0x260] sm:$0xff] }
 0x148   :  { %v1251_v38 = vpack.c.bf16 %v629_v35, %v623_v34 }
 0x149   :  { %v541_v24 = vadd.f32 %v1548_v36, %v529_v17  ;;  %758 = vmatmul.mubr.f32.gmra.mrb[18].mxu0 %v545_v16  ;;  %853 = vmatmul.mubr.f32.gmra.mrb[34].mxu1 %v545_v16  ;;  %v636_v36 = vld [vmem:[#allocation7 + $0x2c8] sm:$0xff] }
 0x14a   :  { %1240 = vmatpush1.bf16.msra.mxu0 %v1239_v15  ;;  %763 = vmatprep.mubr.f32.mxu0 %v1400_v1  ;;  %v1253_v39 = vpack.c.bf16 %v642_v37, %v636_v36 }
 0x14b   :  { %v546_v26 = vmax.f32 %v541_v24, 0.0  ;;  %858 = vmatprep.mubr.f32.mxu1 %v1400_v1  ;;  %1242 = vmatprep.subr.bf16.mxu0 %v1241_v18 }
 0x14d   :  { %764 = vmatmul.mubr.f32.gmra.mrb[20].mxu0 %v546_v26  ;;  %859 = vmatmul.mubr.f32.gmra.mrb[36].mxu1 %v546_v26 }
 0x14e   :  { %1244 = vmatpush1.bf16.msra.mxu0 %v1243_v25  ;;  %929 = vmatprep.mubr.f32.mxu0 %v1400_v1 }
 0x14f   :  { %1246 = vmatprep.subr.bf16.mxu0 %v1245_v27 }
 0x152   :  { %1248 = vmatpush1.bf16.msra.mxu0 %v1247_v32 }
 0x153   :  { %1250 = vmatprep.subr.bf16.mxu0 %v1249_v33 }
 0x156   :  { %1252 = vmatpush1.bf16.msra.mxu0 %v1251_v38 }
 0x157   :  { %1254 = vmatprep.subr.bf16.mxu0 %v1253_v39 }
 0x15a   :  { %1256 = vmatpush1.bf16.msra.mxu0 %v1255_v42 }
 0x15d   :  { %930 = vmatmul.mubr.f32.vlgmr.msra.gmra.mrb[22].mxu0 %v1551_v46  ;;  %v655_v46 = vsub.s32 2, %v1583_v44 }
 0x15e   :  { %935 = vmatprep.mubr.f32.mxu0 %v1400_v1 }
 0x161   :  { %936 = vmatmul.mubr.f32.gmra.mrb[24].mxu0 %v1557_v57 }
 0x162   :  { %941 = vmatprep.mubr.f32.mxu0 %v1400_v1 }
 0x165   :  { %942 = vmatmul.mubr.f32.gmra.mrb[26].mxu0 %v1564_v5 }
 0x166   :  { %947 = vmatprep.mubr.f32.mxu0 %v1400_v1 }
 0x169   :  { %948 = vmatmul.mubr.f32.gmra.mrb[28].mxu0 %v545_v16 }
 0x16a   :  { %953 = vmatprep.mubr.f32.mxu0 %v1400_v1  ;;  %v656_v1 = vrot.slane %v1590_v47, %v655_v46 }
 0x16d   :  { %954 = vmatmul.mubr.f32.gmra.mrb[30].mxu0 %v546_v26 }
 0x210   :  { %v741_v53 = vpop.f32.mrb[12].mxu0  ;;  %v836_v54 = vpop.f32.mrb[28].mxu1 }
 0x211   :  { %v742_v55 = vadd.f32 %v741_v53, %v648_v50  ;;  %v837_v56 = vadd.f32 %v836_v54, %v656_v1  ;;  %v743_v57 = vpop.f32.mrb[13].mxu0  ;;  %v838_v58 = vpop.f32.mrb[29].mxu1 }
 0x212   :  { %v744_v59 = vadd.f32 %v743_v57, %v652_v51  ;;  %v839_v60 = vadd.f32 %v838_v58, %v660_v52 }
 0x213   :  { %960 = vst [vmem:[#allocation8] sm:$0xff] %v742_v55  ;;  %962 = vst [vmem:[#allocation8 + $0x10] sm:$0xff] %v837_v56 }
 0x214   :  { %961 = vst [vmem:[#allocation8 + $0x8] sm:$0xff] %v744_v59  ;;  %975 = vst [vmem:[#allocation9] sm:$0xff] %v839_v60  ;;  %v747_v61 = vpop.f32.mrb[14].mxu0  ;;  %v842_v62 = vpop.f32.mrb[30].mxu1 }
 0x215   :  { %v748_v63 = vadd.f32 %v747_v61, %v648_v50  ;;  %v843_v0 = vadd.f32 %v842_v62, %v656_v1  ;;  %v749_v2 = vpop.f32.mrb[15].mxu0  ;;  %v844_v3 = vpop.f32.mrb[31].mxu1 }
 0x216   :  { %v750_v4 = vadd.f32 %v749_v2, %v652_v51  ;;  %v845_v5 = vadd.f32 %v844_v3, %v660_v52 }
 0x217   :  { %963 = vst [vmem:[#allocation8 + $0x18] sm:$0xff] %v748_v63  ;;  %965 = vst [vmem:[#allocation8 + $0x28] sm:$0xff] %v843_v0 }
 0x218   :  { %964 = vst [vmem:[#allocation8 + $0x20] sm:$0xff] %v750_v4  ;;  %978 = vst [vmem:[#allocation9 + $0x18] sm:$0xff] %v845_v5  ;;  %v753_v6 = vpop.f32.mrb[16].mxu0  ;;  %v848_v7 = vpop.f32.mrb[32].mxu1 }
 0x219   :  { %v754_v8 = vadd.f32 %v753_v6, %v648_v50  ;;  %v849_v9 = vadd.f32 %v848_v7, %v656_v1  ;;  %v755_v10 = vpop.f32.mrb[17].mxu0  ;;  %v850_v11 = vpop.f32.mrb[33].mxu1 }
 0x21a   :  { %v756_v12 = vadd.f32 %v755_v10, %v652_v51  ;;  %v851_v13 = vadd.f32 %v850_v11, %v660_v52 }
 0x21b   :  { %966 = vst [vmem:[#allocation8 + $0x30] sm:$0xff] %v754_v8  ;;  %968 = vst [vmem:[#allocation8 + $0x40] sm:$0xff] %v849_v9 }
 0x21c   :  { %967 = vst [vmem:[#allocation8 + $0x38] sm:$0xff] %v756_v12  ;;  %981 = vst [vmem:[#allocation9 + $0x30] sm:$0xff] %v851_v13  ;;  %v759_v14 = vpop.f32.mrb[18].mxu0  ;;  %v854_v15 = vpop.f32.mrb[34].mxu1 }
 0x21d   :  { %v760_v16 = vadd.f32 %v759_v14, %v648_v50  ;;  %v855_v17 = vadd.f32 %v854_v15, %v656_v1  ;;  %v761_v18 = vpop.f32.mrb[19].mxu0  ;;  %v856_v19 = vpop.f32.mrb[35].mxu1 }
 0x21e   :  { %v762_v20 = vadd.f32 %v761_v18, %v652_v51  ;;  %v857_v21 = vadd.f32 %v856_v19, %v660_v52 }
 0x21f   :  { %969 = vst [vmem:[#allocation8 + $0x48] sm:$0xff] %v760_v16  ;;  %971 = vst [vmem:[#allocation8 + $0x58] sm:$0xff] %v855_v17 }
 0x220   :  { %970 = vst [vmem:[#allocation8 + $0x50] sm:$0xff] %v762_v20  ;;  %984 = vst [vmem:[#allocation9 + $0x48] sm:$0xff] %v857_v21  ;;  %v765_v22 = vpop.f32.mrb[20].mxu0  ;;  %v860_v23 = vpop.f32.mrb[36].mxu1 }
 0x221   :  { %v766_v24 = vadd.f32 %v765_v22, %v648_v50  ;;  %v861_v25 = vadd.f32 %v860_v23, %v656_v1  ;;  %v767_v26 = vpop.f32.mrb[21].mxu0  ;;  %v862_v27 = vpop.f32.mrb[37].mxu1 }
 0x222   :  { %v768_v28 = vadd.f32 %v767_v26, %v652_v51  ;;  %v863_v29 = vadd.f32 %v862_v27, %v660_v52 }
 0x223   :  { %972 = vst [vmem:[#allocation8 + $0x60] sm:$0xff] %v766_v24  ;;  %974 = vst [vmem:[#allocation8 + $0x70] sm:$0xff] %v861_v25 }
 0x224   :  { %973 = vst [vmem:[#allocation8 + $0x68] sm:$0xff] %v768_v28  ;;  %987 = vst [vmem:[#allocation9 + $0x60] sm:$0xff] %v863_v29 }
 0x225   :  { %1350 = shalt.err (!%p1347_p0)
}
 0x226   :  { %s1351_s17 = scalar_lea.hbm %s1637_s5, 1920 }
 0x227   :  { %p1352_p1 = scmp.ne.s32.totalorder %s1637_s5, %s1351_s17  ;;  %p1355_p2 = scmp.lt.u32.totalorder %s1351_s17, %s1637_s5 }
 0x229   :  { %p1357_p3 = pnand %p1355_p2, %p1352_p1 }
 0x22b   :  { %1360 = shalt.err (!%p1357_p3)
}
 0x22c   :  { %s1402_s21 = smov 384   ;;  %s1403_s22 = smov 24   ;;  %v663_v30 = vsub.s32 4, %v1583_v44  ;;  %v667_v31 = vsub.s32 5, %v1583_v44 }
 0x22d   :  { %1001 = dma.vmem_to_hbm [thread:$0]  %s996_s13, 1920, %s1637_s5, [#allocation4], %s1402_s21, %s1402_s21, %s1403_s22  }
 0x22e   :  { %v664_v32 = vrot.slane %v1590_v47, %v663_v30  ;;  %v668_v33 = vrot.slane %v1590_v47, %v667_v31  ;;  %s1404_s5 = smov [#allocation9]  }
 0x22f   :  { %s1007_s26 = sshll.u32 %s1404_s5, 4  ;;  %s1008_s26 = int_to_ptr.vmem [resolvable:$true] %s1007_s26 }
 0x230   :  { %v931_v34 = vpop.f32.mrb[22].mxu0  ;;  %s1361_s27 = scalar_lea.vmem %s1008_s26, 1920  ;;  %p1366_p5 = scmp.lt.s32.totalorder %s1008_s26, %s1008_s26 }
 0x231   :  { %v932_v35 = vadd.f32 %v931_v34, %v664_v32  ;;  %v933_v36 = vpop.f32.mrb[23].mxu0  ;;  %p1362_p4 = scmp.ne.s32.totalorder %s1008_s26, %s1361_s27  ;;  %p1367_p6 = scmp.lt.s32.totalorder %s1361_s27, %s1361_s27 }
 0x232   :  { %v934_v37 = vadd.f32 %v933_v36, %v668_v33 }
 0x233   :  { %976 = vst [vmem:[#allocation9 + $0x8] sm:$0xff] %v932_v35  ;;  %p1368_p7 = por %p1367_p6, %p1366_p5 }
 0x234   :  { %977 = vst [vmem:[#allocation9 + $0x10] sm:$0xff] %v934_v37  ;;  %v937_v38 = vpop.f32.mrb[24].mxu0 }
 0x235   :  { %v938_v39 = vadd.f32 %v937_v38, %v664_v32  ;;  %v939_v40 = vpop.f32.mrb[25].mxu0  ;;  %p1369_p8 = pnand %p1368_p7, %p1362_p4 }
 0x236   :  { %v940_v41 = vadd.f32 %v939_v40, %v668_v33 }
 0x237   :  { %979 = vst [vmem:[#allocation9 + $0x20] sm:$0xff] %v938_v39 }
 0x238   :  { %980 = vst [vmem:[#allocation9 + $0x28] sm:$0xff] %v940_v41  ;;  %v943_v42 = vpop.f32.mrb[26].mxu0 }
 0x239   :  { %v944_v43 = vadd.f32 %v943_v42, %v664_v32  ;;  %v945_v45 = vpop.f32.mrb[27].mxu0 }
 0x23a   :  { %v946_v44 = vadd.f32 %v945_v45, %v668_v33 }
 0x23b   :  { %982 = vst [vmem:[#allocation9 + $0x38] sm:$0xff] %v944_v43 }
 0x23c   :  { %983 = vst [vmem:[#allocation9 + $0x40] sm:$0xff] %v946_v44  ;;  %v949_v46 = vpop.f32.mrb[28].mxu0 }
 0x23d   :  { %v950_v47 = vadd.f32 %v949_v46, %v664_v32  ;;  %v951_v48 = vpop.f32.mrb[29].mxu0 }
 0x23e   :  { %v952_v49 = vadd.f32 %v951_v48, %v668_v33 }
 0x23f   :  { %985 = vst [vmem:[#allocation9 + $0x50] sm:$0xff] %v950_v47 }
 0x240   :  { %986 = vst [vmem:[#allocation9 + $0x58] sm:$0xff] %v952_v49  ;;  %v955_v50 = vpop.f32.mrb[30].mxu0 }
 0x241   :  { %v956_v1 = vadd.f32 %v955_v50, %v664_v32  ;;  %v957_v51 = vpop.f32.mrb[31].mxu0 }
 0x242   :  { %v958_v52 = vadd.f32 %v957_v51, %v668_v33 }
 0x243   :  { %988 = vst [vmem:[#allocation9 + $0x68] sm:$0xff] %v956_v1 }
 0x244   :  { %989 = vst [vmem:[#allocation9 + $0x70] sm:$0xff] %v958_v52 }
 0x245   :  { %1372 = shalt.err (!%p1369_p8)
}
 0x246   :  { %s1373_s30 = scalar_lea.hbm %s1638_s6, 1920 }
 0x247   :  { %p1374_p9 = scmp.ne.s32.totalorder %s1638_s6, %s1373_s30  ;;  %p1377_p10 = scmp.lt.u32.totalorder %s1373_s30, %s1638_s6 }
 0x249   :  { %p1379_p11 = pnand %p1377_p10, %p1374_p9 }
 0x24b   :  { %1382 = shalt.err (!%p1379_p11)
}
 0x24c   :  { %1013 = dma.vmem_to_hbm [thread:$0]  %s1008_s26, 1920, %s1638_s6, [#allocation10], %s1402_s21, %s1402_s21, %s1403_s22  }
 0x24d   :  { %1387 = dma.done.wait [#allocation4], 1920  }
 0x24e   :  { %1388 = vsyncadd [#allocation4], 4294965376 }
 0x24f   :  { %1389 = dma.done.wait [#allocation10], 1920  }
 0x250   :  { %1390 = vsyncadd [#allocation10], 4294965376 }
 0x251   :  { %1020 = vsyncpa [#allocation3], 1 }
 0x252   :  { %1021 = vsyncpa [#allocation6], 1 }
 0x253   :  { %1022 = vsyncpa [#allocation4], 1 }
 0x254   :  { %1023 = vsyncpa [#allocation10], 1 }

</bundles_post_ra>
